<compile_context>
chip_gen: v7x
topology: tpu7x:2x2x1
jax: 0.10.0
libtpu: 0.0.40
codegen_flags: <defaults>
</compile_context>

<pallas_src>
import numpy as np
import jax
import jax.numpy as jnp
from jax.experimental import pallas as pl
from jax.experimental.pallas import tpu as pltpu


def dimension_split(in_channels, m):
    """Even contiguous split of `in_channels` into m chunks; returns boundaries."""
    base, rem = divmod(in_channels, m)
    sizes = [base + (1 if i < rem else 0) for i in range(m)]
    ds = [0]
    for s in sizes:
        ds.append(ds[-1] + s)
    return ds


def _round_up(x, n):
    return ((x + n - 1) // n) * n


def _im2col(x, kh, kw, stride, padding, dilation):
    """x: (N, C, H, W) -> (N*Ho*Wo, C*kh*kw), column order (c, kh, kw)."""
    n, c, h, w = x.shape
    ho = (h + 2 * padding - dilation * (kh - 1) - 1) // stride + 1
    wo = (w + 2 * padding - dilation * (kw - 1) - 1) // stride + 1
    xp = jnp.pad(x, ((0, 0), (0, 0), (padding, padding), (padding, padding)))
    patches = []
    for ki in range(kh):
        for kj in range(kw):
            sub = xp[:, :,
                     ki * dilation: ki * dilation + (ho - 1) * stride + 1: stride,
                     kj * dilation: kj * dilation + (wo - 1) * stride + 1: stride]
            patches.append(sub)  # (N, C, Ho, Wo)
    p = jnp.stack(patches, axis=2)                 # (N, C, kh*kw, Ho, Wo)
    p = jnp.transpose(p, (0, 3, 4, 1, 2))          # (N, Ho, Wo, C, kh*kw)
    return p.reshape(n * ho * wo, c * kh * kw), ho, wo


def _pq_gemm_kernel(p_ref, w_ref, b_ref, out_ref):
    # One fused MXU GEMM per tile: (tm, K_pad)bf16 @ (K_pad, C_pad)bf16 -> f32.
    acc = jnp.dot(p_ref[...], w_ref[...], preferred_element_type=jnp.float32)
    out_ref[...] = (acc + b_ref[...]).astype(out_ref.dtype)


def _choose_tm(mrows, tm_max):
    """Row tile: multiple of 8, <= tm_max, prefer >=2 grid steps (megacore)."""
    rows8 = _round_up(mrows, 8)
    tm = max(8, min(tm_max, rows8))
    tm = (tm // 8) * 8
    if rows8 // tm < 2 and rows8 >= 16:
        tm = min(tm_max, _round_up((rows8 + 1) // 2, 8))
    return max(8, tm)


def pq_conv_forward(x, weights, biases, idxs, *, out_channels, kernel_size,
                    stride, padding, dilation, groups, m, ks, tm=512):
    assert groups == 1  # TODO(synk): grouped inner Conv2d not implemented
    n, c_in, h, w = x.shape
    kh = kw = kernel_size
    kk = kh * kw
    ds = dimension_split(c_in, m)

    # ---- host-side im2col ----------------------------------------------
    p, ho, wo = _im2col(x, kh, kw, stride, padding, dilation)
    mrows, ktot = p.shape

    # ---- fold conv weights + index_select + group sum into one GEMM -----
    w_blocks = []
    bias_eff = jnp.zeros((out_channels,), jnp.float32)
    for i in range(m):
        c_i = ds[i + 1] - ds[i]
        w_i = weights[i].reshape(ks, c_i * kk).astype(jnp.float32)   # (ks, K_i)
        # index_select over codebook channels == gather rows by idx, transpose.
        w_blocks.append(jnp.take(w_i, idxs[i], axis=0).T)            # (K_i, C_out)
        bias_eff = bias_eff + jnp.take(biases[i].astype(jnp.float32), idxs[i])
    w_eff = jnp.concatenate(w_blocks, axis=0)                        # (K_tot, C_out)

    # ---- pad to lane-dense shapes ---------------------------------------
    k_pad = _round_up(ktot, 128)
    c_pad = _round_up(out_channels, 128)
    tm = _choose_tm(mrows, tm)
    m_pad = pl.cdiv(mrows, tm) * tm

    p = jnp.pad(p, ((0, m_pad - mrows), (0, k_pad - ktot))).astype(jnp.bfloat16)
    w_eff = jnp.pad(w_eff, ((0, k_pad - ktot),
                            (0, c_pad - out_channels))).astype(jnp.bfloat16)
    bias_eff = jnp.pad(bias_eff, (0, c_pad - out_channels)).reshape(1, c_pad)

    grid = (m_pad // tm,)

    # ---- VMEM budget / compiler params -----------------------------------
    vmem_need = (2 * tm * k_pad * 2          # P block, bf16, double-buffered
                 + 2 * k_pad * c_pad * 2     # fused weight, bf16
                 + 2 * tm * c_pad * 4        # output block, f32
                 + 2 * 8 * c_pad * 4)        # bias
    cp_kwargs = dict(dimension_semantics=("parallel",))
    if vmem_need > (32 << 20):
        # Raise the scoped limit only when needed; keep headroom under v7x's
        # 64 MiB physical VMEM.
        cp_kwargs["vmem_limit_bytes"] = min(vmem_need + (4 << 20), 56 << 20)

    cost = pl.CostEstimate(
        flops=2 * m_pad * k_pad * c_pad,
        transcendentals=0,
        bytes_accessed=(m_pad * k_pad * 2 + k_pad * c_pad * 2
                        + m_pad * c_pad * 4 + c_pad * 4))

    out = pl.pallas_call(
        _pq_gemm_kernel,
        out_shape=jax.ShapeDtypeStruct((m_pad, c_pad), jnp.float32),
        grid=grid,
        in_specs=[
            pl.BlockSpec((tm, k_pad), lambda i: (i, 0)),
            pl.BlockSpec((k_pad, c_pad), lambda i: (0, 0)),
            pl.BlockSpec((1, c_pad), lambda i: (0, 0)),
        ],
        out_specs=pl.BlockSpec((tm, c_pad), lambda i: (i, 0)),
        compiler_params=pltpu.CompilerParams(**cp_kwargs),
        cost_estimate=cost,
    )(p, w_eff, bias_eff)

    out = out[:mrows, :out_channels].reshape(n, ho, wo, out_channels)
    return jnp.transpose(out, (0, 3, 1, 2))  # back to NCHW


def pq_conv_reference(x, weights, biases, idxs, *, kernel_size, stride,
                      padding, dilation, m):
    ds = dimension_split(x.shape[1], m)
    outs = []
    for i in range(m):
        xi = x[:, ds[i]:ds[i + 1]]
        yi = jax.lax.conv_general_dilated(
            xi, weights[i], (stride, stride),
            [(padding, padding), (padding, padding)],
            rhs_dilation=(dilation, dilation),
            dimension_numbers=("NCHW", "OIHW", "NCHW"))
        yi = yi + biases[i][None, :, None, None]
        yi = yi[:, idxs[i]]
        outs.append(yi)
    return jnp.sum(jnp.stack(outs, axis=0), axis=0)


if __name__ == "__main__":
    # Small deterministic config: PQConvLayer(in=8, out=16, k=3, stride=1,
    # padding=1, dilation=1, groups=1, bias=True, m=2, ks=8)
    N, C_in, H, W = 2, 8, 8, 8
    C_out, ksize, stride, padding, dilation, groups = 16, 3, 1, 1, 1, 1
    m, ks = 2, 8

    key = jax.random.PRNGKey(0)
    kx, key = jax.random.split(key)
    x = jax.random.normal(kx, (N, C_in, H, W), dtype=jnp.float32)

    ds = dimension_split(C_in, m)
    weights, biases, idxs = [], [], []
    for i in range(m):
        c_i = ds[i + 1] - ds[i]
        kw_, kb_, ki_, key = jax.random.split(key, 4)
        weights.append(0.1 * jax.random.normal(kw_, (ks, c_i, ksize, ksize),
                                               dtype=jnp.float32))
        biases.append(0.1 * jax.random.normal(kb_, (ks,), dtype=jnp.float32))
        idxs.append(jax.random.randint(ki_, (C_out,), 0, ks, dtype=jnp.int32))

    y = pq_conv_forward(x, weights, biases, idxs,
                        out_channels=C_out, kernel_size=ksize, stride=stride,
                        padding=padding, dilation=dilation, groups=groups,
                        m=m, ks=ks)
    y = jax.block_until_ready(y)

    y_ref = pq_conv_reference(x, weights, biases, idxs, kernel_size=ksize,
                              stride=stride, padding=padding,
                              dilation=dilation, m=m)
    assert y.shape == (N, C_out, H, W)
    # Tolerance slightly loosened vs the f32 version: P and the fused weight
    # are fed to the MXU in bf16 (accumulation is f32).
    np.testing.assert_allclose(np.asarray(y), np.asarray(y_ref),
                               rtol=2e-2, atol=2e-2)
    print("KERNEL_OK")
</pallas_src>

<mosaic_0001>
module attributes {stable_mosaic.version = 11 : i64} {
  func.func @_pq_gemm_kernel(%arg0: i32, %arg1: memref<64x128xbf16, #tpu.memory_space<vmem>>, %arg2: memref<128x128xbf16, #tpu.memory_space<vmem>>, %arg3: memref<1x128xf32, #tpu.memory_space<vmem>>, %arg4: memref<64x128xf32, #tpu.memory_space<vmem>>) attributes {dimension_semantics = [#tpu.dimension_semantics<parallel>], iteration_bounds = array<i64: 2>, scalar_prefetch = 0 : i64, scratch_operands = 0 : i64, tpu.core_type = #tpu.core_type<tc>, window_params = [{transform_indices = @transform_0, window_bounds = array<i64: 64, 128>}, {pipeline_mode = #tpu.pipeline_mode<synchronous>, transform_indices = @transform_1, window_bounds = array<i64: 128, 128>}, {pipeline_mode = #tpu.pipeline_mode<synchronous>, transform_indices = @transform_2, window_bounds = array<i64: 1, 128>}, {transform_indices = @transform_3, window_bounds = array<i64: 64, 128>}]} {
    %c0 = arith.constant 0 : index
    %c0_0 = arith.constant 0 : index
    %0 = vector.load %arg1[%c0, %c0_0] : memref<64x128xbf16, #tpu.memory_space<vmem>>, vector<64x128xbf16>
    %c0_1 = arith.constant 0 : index
    %c0_2 = arith.constant 0 : index
    %1 = vector.load %arg2[%c0_1, %c0_2] : memref<128x128xbf16, #tpu.memory_space<vmem>>, vector<128x128xbf16>
    %cst = arith.constant dense<0.000000e+00> : vector<64x128xf32>
    %2 = tpu.matmul %0, %1, %cst {dimension_numbers = #tpu.dot_dimension_numbers<[1], [0], [0], [1], [0, 0, 1, 1], [], []>} : vector<64x128xbf16>, vector<128x128xbf16>, vector<64x128xf32> -> vector<64x128xf32>
    %c0_3 = arith.constant 0 : index
    %c0_4 = arith.constant 0 : index
    %3 = vector.load %arg3[%c0_3, %c0_4] : memref<1x128xf32, #tpu.memory_space<vmem>>, vector<1x128xf32>
    %4 = vector.broadcast %3 : vector<1x128xf32> to vector<64x128xf32>
    %5 = arith.addf %2, %4 : vector<64x128xf32>
    %c0_5 = arith.constant 0 : index
    %c0_6 = arith.constant 0 : index
    %6 = vector.load %arg4[%c0_5, %c0_6] : memref<64x128xf32, #tpu.memory_space<vmem>>, vector<64x128xf32>
    tpu.vector_store %arg4[%c0_5, %c0_6], %5 {strides = array<i32>} : memref<64x128xf32, #tpu.memory_space<vmem>>, vector<64x128xf32>,
    return
  }
  func.func @transform_0(%arg0: i32) -> (i32, i32) {
    %c0_i32 = arith.constant 0 : i32
    %c0_i32_0 = arith.constant 0 : i32
    return %arg0, %c0_i32 : i32, i32
  }
  func.func @transform_1(%arg0: i32) -> (i32, i32) {
    %c0_i32 = arith.constant 0 : i32
    %c0_i32_0 = arith.constant 0 : i32
    %c0_i32_1 = arith.constant 0 : i32
    return %c0_i32, %c0_i32_0 : i32, i32
  }
  func.func @transform_2(%arg0: i32) -> (i32, i32) {
    %c0_i32 = arith.constant 0 : i32
    %c0_i32_0 = arith.constant 0 : i32
    %c0_i32_1 = arith.constant 0 : i32
    return %c0_i32, %c0_i32_0 : i32, i32
  }
  func.func @transform_3(%arg0: i32) -> (i32, i32) {
    %c0_i32 = arith.constant 0 : i32
    %c0_i32_0 = arith.constant 0 : i32
    return %arg0, %c0_i32 : i32, i32
  }
}

</mosaic_0001>

<bundles_post_ra>
// kernel: tpu_custom_call.1
= control target key start
LH: loop header
LB: loop body
LE: loop exit
PB: predicated region body
PF: predicated region fallthrough
CT: control target
= control target key end

     0   :  { %8 = vsyncpa [#allocation3], 0  ;;  %s1010_s0 = inlined_call_operand.hbm [shape: bf16[128,128], index: 0, kind: input, shape index: {}]   ;;  %s1011_s1 = inlined_call_operand.hbm [shape: bf16[128,128], index: 1, kind: input, shape index: {}]   ;;  %s1012_s2 = inlined_call_operand.vmem [shape: f32[1,128], index: 2, kind: input, shape index: {}]   ;;  %s1013_s3 = inlined_call_operand.hbm [shape: f32[128,128], index: 3, kind: output, shape index: {}]  }
   0x1   :  { %10 = vsyncpa [#allocation3 + $0x1], 0 }
   0x2   :  { %11 = vsyncpa [#allocation6], 0 }
   0x3   :  { %12 = vsyncpa [#allocation4], 0 }
   0x4   :  { %14 = vsyncpa [#allocation4 + $0x1], 0  ;;  %s793_s12 = smov 0   ;;  %s795_s13 = smov 0  }
   0x5   :  { %s797_s14 = smov 0   ;;  %s799_s15 = smov 0  }
   0x6 LB: > { %s814_s16 = sadd.s32 4294967295, %s764_s15   ;;  %s480_s17 = sadd.s32 4294967294, %s764_s15   ;;  %s764_s15 = sphi %s799_s15, %s1033_s15   ;;  %s760_s14 = sphi %s797_s14, %s1032_s14   ;;  %s756_s13 = sphi %s795_s13, %s1031_s13   ;;  %s752_s12 = sphi %s793_s12, %s1030_s12  }
   0x7   : > { %p40_p0 = scmp.ne.s32.totalorder %s756_s13, %s752_s12  ;;  %p1014_p1 = scmp.eq.s32.totalorder %s814_s16, 0 }
   0x8   : > { %p112_p3 = scmp.eq.s32.totalorder %s480_s17, 1  ;;  %p481_p5 = scmp.ge.s32.totalorder %s764_s15, 1 }
   0x9   : > { %p823_p4 = por %p1014_p1, %p40_p0  ;;  %p119_p7 = scmp.lt.s32.totalorder %s764_s15, 3 }
   0xa   : > { %p828_p6 = por %p112_p3, %p40_p0  ;;  %s766_s21 = smov [#allocation5]  }
   0xb   : > { %s1017_s18 = scalar_select %p823_p4, 1, 0 }
   0xc   : > { %s1018_s19 = scalar_select %p828_p6, 1, 0 }
   0xd   : > { %p833_p8 = pnand %p481_p5, %p119_p7  ;;  %s131_s22 = sshll.u32 %s766_s21, 4  ;;  %s837_s22 = int_to_ptr.vmem [resolvable:$true] %s131_s22 }
   0xe   : > { %s849_s24 = sadd.s32 1, %s764_s15   ;;  %s27_s25 = sadd.s32 1, %s760_s14 }
   0xf   : > { %s1019_s20 = scalar_select %p833_p8, 1, 0 }
  0x10   : > { %p571_p9 = pneg %p833_p8  ;;  %s24_s26 = ssub.s32 %s764_s15, %s849_s24 }
  0x11   : > { %s636_s29 = scalar_lea.hbm %s1011_s1, 1024 }
  0x12   : > { %p844_p11 = pnand %p571_p9, %p1014_p1  ;;  %p637_p12 = scmp.ne.s32.totalorder %s1011_s1, %s636_s29 }
  0x13   : > { %p643_p5 = scmp.lt.u32.totalorder %s636_s29, %s1011_s1 }
  0x14   : > { %p638_p13 = pneg %p844_p11 }
  0x16   : > { %p639_p0 = pnand %p638_p13, %p637_p12 }
  0x18   : > { %p640_p3 = pneg %p639_p0 }
  0x1a   : > { %p645_p7 = pnand %p643_p5, %p640_p3 }
  0x1c   : > { %648 = shalt.err (!%p645_p7)
}
  0x1d   : > { %s649_s7 = scalar_lea.vmem %s837_s22, 1024  ;;  %p657_p2 = scmp.lt.s32.totalorder %s837_s22, %s837_s22 }
  0x1e   : > { %p650_p9 = scmp.ne.s32.totalorder %s837_s22, %s649_s7  ;;  %p658_p6 = scmp.lt.s32.totalorder %s649_s7, %s649_s7 }
  0x20   : > { %p652_p10 = pnand %p650_p9, %p638_p13  ;;  %p659_p4 = por %p658_p6, %p657_p2 }
  0x22   : > { %p653_p1 = pneg %p652_p10 }
  0x24   : > { %p660_p8 = pnand %p659_p4, %p653_p1 }
  0x26   : > { %663 = shalt.err (!%p660_p8)
}
  0x27   : > { %s767_s8 = smov 64   ;;  %s768_s9 = smov 4  }
  0x28   : > { %574 = dma.hbm_to_vmem [thread:$0]  (!%p844_p11), %s1011_s1, 1024, %s837_s22, [#allocation6], %s767_s8, %s767_s8, %s768_s9  }
  0x29   : > { %p25_p1 = scmp.eq.s32.totalorder %s24_s26, 0  ;;  %p34_p2 = scmp.ne.s32.totalorder %s760_s14, %s756_s13 }
  0x2a   : > { %p35_p4 = scmp.eq.s32.totalorder %s764_s15, 0  ;;  %p584_p6 = scmp.lt.s32.totalorder %s764_s15, 2 }
  0x2b   : > { %s883_s17 = scalar_select %p25_p1, %s760_s14, %s27_s25  }
  0x2c   : > { %p36_p8 = por %p35_p4, %p34_p2  ;;  %p1021_p10 = scmp.eq.s32.totalorder %s814_s16, 1 }
  0x2d   : > { %s148_s23 = sand.u32 1, %s760_s14   ;;  %s509_s27 = sshll.u32 %s764_s15, 9 }
  0x2e   : > { %p887_p12 = por %p1021_p10, %p34_p2  ;;  %s484_s28 = sshll.u32 %s148_s23, 5 }
  0x2f   : > { %s896_s4 = scalar_lea.hbm %s1010_s0, %s509_s27  ;;  %s152_s22 = scalar_lea.vmem [#allocation2], %s484_s28 }
  0x30   : > { %s159_s25 = sshll.u32 %s152_s22, 4  ;;  %p898_p11 = pnand %p584_p6, %p36_p8  ;;  %s902_s25 = int_to_ptr.vmem [resolvable:$true] %s159_s25 }
  0x31   : > { %s904_s5 = scalar_lea.sflag [#allocation3], %s148_s23  ;;  %s664_s6 = scalar_lea.hbm %s896_s4, 512 }
  0x32   : > { %p665_p13 = scmp.ne.s32.totalorder %s896_s4, %s664_s6  ;;  %p666_p0 = pneg %p898_p11 }
  0x33   : > { %s669_s11 = scalar_lea.hbm %s1010_s0, 1024  ;;  %p670_p7 = scmp.lt.u32.totalorder %s896_s4, %s1010_s0 }
  0x34   : > { %p667_p3 = pnand %p666_p0, %p665_p13  ;;  %p671_p9 = scmp.lt.u32.totalorder %s669_s11, %s664_s6 }
  0x35   : > { %p673_p2 = scmp.lt.u32.totalorder %s664_s6, %s896_s4 }
  0x36   : > { %p668_p5 = pneg %p667_p3  ;;  %p672_p1 = por %p671_p9, %p670_p7 }
  0x38   : > { %p674_p4 = por %p673_p2, %p672_p1 }
  0x3a   : > { %p675_p6 = pnand %p674_p4, %p668_p5 }
  0x3c   : > { %678 = shalt.err (!%p675_p6)
}
  0x3d   : > { %s679_s23 = scalar_lea.vmem %s902_s25, 512  ;;  %s769_s29 = smov [#allocation2]  }
  0x3e   : > { %p680_p8 = scmp.ne.s32.totalorder %s902_s25, %s679_s23  ;;  %s684_s30 = sshll.u32 %s769_s29, 4  ;;  %s685_s30 = int_to_ptr.vmem [resolvable:$false] %s684_s30 }
  0x3f   : > { %s686_s22 = scalar_lea.vmem %s685_s30, 1024  ;;  %p687_p3 = scmp.lt.s32.totalorder %s902_s25, %s685_s30 }
  0x40   : > { %p682_p10 = pnand %p680_p8, %p666_p0  ;;  %p688_p7 = scmp.lt.s32.totalorder %s686_s22, %s679_s23 }
  0x42   : > { %p683_p13 = pneg %p682_p10  ;;  %p689_p9 = por %p688_p7, %p687_p3 }
  0x44   : > { %p690_p1 = pnand %p689_p9, %p683_p13 }
  0x46   : > { %693 = shalt.err (!%p690_p1)
}
  0x47   : > { %578 = dma.hbm_to_vmem [thread:$0]  (!%p898_p11), %s896_s4, 512, %s902_s25, %s904_s5, %s767_s8, %s767_s8, %s768_s9  }
  0x48   : > { %p1024_p0 = scmp.ne.s32.totalorder %s1019_s20, 0 }
  0x49   : > { %s938_s6 = sand.u32 (!%p1024_p0), 1, %s756_s13   ;;  %p1025_p5 = scmp.ne.s32.totalorder (!%p1024_p0), %s1017_s18, 0 }
  0x4a   : > { %171 = sbr.rel (%p1024_p0) target bundleno = 350 (0x15e), region = 32  ;;  %s488_s7 = sshll.u32 (!%p1024_p0), %s938_s6, 5 }
  0x4b   : > { %s174_s10 = scalar_lea.sflag (!%p1024_p0), [#allocation3], %s938_s6  ;;  %s942_s11 = scalar_lea.vmem (!%p1024_p0), [#allocation2], %s488_s7 }
  0x51   : > { %739 = dma.done.wait (%p1025_p5), %s174_s10, 512  }
  0x52   : > { %741 = vsyncadd (%p1025_p5), %s174_s10, 4294966784  ;;  %p1026_p11 = scmp.eq.s32.totalorder %s814_s16, 0 }
  0x54   : > { %743 = dma.done.wait (%p1026_p11), [#allocation6], 1024   ;;  %p1027_p2 = pmov %p1026_p11 }
  0x55   : > { %v624_v0 = vld [vmem:[#allocation5] sm:$0xff]   ;;  %v625_v1 = vld [vmem:[#allocation5 + $0x8] sm:$0xff]   ;;  %v626_v2 = vld [vmem:[#allocation5 + $0x10] sm:$0xff]   ;;  %s490_s18 = sshll.u32 %s938_s6, 6  ;;  %s510_s25 = sshll.u32 %s814_s16, 10 }
  0x56   : > { %745 = vsyncadd (%p1027_p2), [#allocation6], 4294966272  ;;  %523 = vmatprep.subr.bf16.mxu0 %v624_v0  ;;  %547 = vmatprep.subr.bf16.mxu1 %v624_v0  ;;  %v627_v3 = vld [vmem:[#allocation5 + $0x18] sm:$0xff]   ;;  %v632_v4 = vld [vmem:[%s942_s11] sm:$0xff]   ;;  %s203_s9 = scalar_lea.vmem [#allocation7], %s490_s18  ;;  %s966_s5 = scalar_lea.hbm %s1013_s3, %s510_s25 }
  0x57   : > { %524 = vmatpush3.bf16.msra.mxu0 %v624_v0  ;;  %555 = vmatpush3.bf16.msra.mxu1 %v624_v0  ;;  %v633_v5 = vld [vmem:[%s942_s11 + $0x10] sm:$0xff]   ;;  %v628_v6 = vld [vmem:[#allocation5 + $0x20] sm:$0xff]   ;;  %v629_v7 = vld [vmem:[#allocation5 + $0x28] sm:$0xff]   ;;  %s397_s4 = sshll.u32 %s203_s9, 4  ;;  %s384_s27 = scalar_lea.sflag [#allocation4], %s938_s6  ;;  %s961_s4 = int_to_ptr.vmem [resolvable:$true] %s397_s4 }
  0x58   : > { %525 = vmatprep.subr.bf16.mxu0 %v625_v1  ;;  %548 = vmatprep.subr.bf16.mxu1 %v625_v1  ;;  %v630_v8 = vld [vmem:[#allocation5 + $0x30] sm:$0xff]   ;;  %v631_v9 = vld [vmem:[#allocation5 + $0x38] sm:$0xff]   ;;  %v634_v10 = vld [vmem:[%s942_s11 + $0x8] sm:$0xff]   ;;  %s694_s28 = scalar_lea.vmem %s961_s4, 1024  ;;  %s770_s23 = smov [#allocation7]  }
  0x59   : > { %539 = vmatprep.mubr.bf16.mxu0 %v632_v4  ;;  %543 = vmatprep.mubr.bf16.mxu1 %v633_v5  ;;  %v635_v11 = vld [vmem:[%s942_s11 + $0x18] sm:$0xff]   ;;  %v491_v12 = vld [vmem:[%s1012_s2] ss:$0 sm:$0xff]  ;;  %p695_p4 = scmp.ne.s32.totalorder %s961_s4, %s694_s28  ;;  %s698_s29 = sshll.u32 %s770_s23, 4  ;;  %s699_s29 = int_to_ptr.vmem [resolvable:$false] %s698_s29 }
  0x5a   : > { %s700_s30 = scalar_lea.vmem %s699_s29, 2048  ;;  %p701_p10 = scmp.lt.s32.totalorder %s961_s4, %s699_s29 }
  0x5b   : > { %526 = vmatpush3.bf16.msra.mxu0 %v625_v1  ;;  %556 = vmatpush3.bf16.msra.mxu1 %v625_v1  ;;  %p696_p6 = pnand %p695_p4, %p887_p12  ;;  %p702_p13 = scmp.lt.s32.totalorder %s700_s30, %s694_s28 }
  0x5c   : > { %527 = vmatprep.subr.bf16.mxu0 %v626_v2  ;;  %549 = vmatprep.subr.bf16.mxu1 %v626_v2 }
  0x5d   : > { %p697_p8 = pneg %p696_p6  ;;  %p703_p3 = por %p702_p13, %p701_p10 }
  0x5f   : > { %528 = vmatpush3.bf16.msra.mxu0 %v626_v2  ;;  %557 = vmatpush3.bf16.msra.mxu1 %v626_v2  ;;  %p704_p7 = pnand %p703_p3, %p697_p8 }
  0x60   : > { %529 = vmatprep.subr.bf16.mxu0 %v627_v3  ;;  %550 = vmatprep.subr.bf16.mxu1 %v627_v3 }
  0x63   : > { %530 = vmatpush3.bf16.msra.mxu0 %v627_v3  ;;  %558 = vmatpush3.bf16.msra.mxu1 %v627_v3 }
  0x64   : > { %531 = vmatprep.subr.bf16.mxu0 %v628_v6  ;;  %551 = vmatprep.subr.bf16.mxu1 %v628_v6 }
  0x67   : > { %532 = vmatpush3.bf16.msra.mxu0 %v628_v6  ;;  %559 = vmatpush3.bf16.msra.mxu1 %v628_v6 }
  0x68   : > { %533 = vmatprep.subr.bf16.mxu0 %v629_v7  ;;  %552 = vmatprep.subr.bf16.mxu1 %v629_v7 }
  0x6b   : > { %534 = vmatpush3.bf16.msra.mxu0 %v629_v7  ;;  %560 = vmatpush3.bf16.msra.mxu1 %v629_v7 }
  0x6c   : > { %535 = vmatprep.subr.bf16.mxu0 %v630_v8  ;;  %553 = vmatprep.subr.bf16.mxu1 %v630_v8 }
  0x6f   : > { %536 = vmatpush3.bf16.msra.mxu0 %v630_v8  ;;  %561 = vmatpush3.bf16.msra.mxu1 %v630_v8 }
  0x70   : > { %537 = vmatprep.subr.bf16.mxu0 %v631_v9  ;;  %554 = vmatprep.subr.bf16.mxu1 %v631_v9 }
  0x73   : > { %538 = vmatpush3.bf16.msra.mxu0 %v631_v9  ;;  %562 = vmatpush3.bf16.msra.mxu1 %v631_v9 }
  0x76   : > { %540 = vmatmul.mubr.bf16.vlgmr.msra.gmra.mrb[0].mxu0 %v634_v10  ;;  %544 = vmatmul.mubr.bf16.vlgmr.msra.gmra.mrb[0].mxu1 %v635_v11 }
 0x149   : > { %v541_v13 = vpop.f32.mrb[0].mxu0  ;;  %v545_v14 = vpop.f32.mrb[0].mxu1 }
 0x14a   : > { %v353_v15 = vadd.f32 %v541_v13, %v491_v12  ;;  %v369_v16 = vadd.f32 %v545_v14, %v491_v12  ;;  %v344_v17 = vpop.f32.mrb[1].mxu0  ;;  %v360_v18 = vpop.f32.mrb[1].mxu1 }
 0x14b   : > { %v345_v19 = vadd.f32 %v491_v12, %v344_v17  ;;  %v361_v20 = vadd.f32 %v491_v12, %v360_v18  ;;  %v542_v21 = vpop.f32.mrb[2].mxu0  ;;  %v546_v22 = vpop.f32.mrb[2].mxu1 }
 0x14c   : > { %377 = vst [vmem:[%s203_s9 + $0x10] sm:$0xff] %v353_v15  ;;  %381 = vst [vmem:[%s203_s9 + $0x30] sm:$0xff] %v369_v16  ;;  %v356_v23 = vadd.f32 %v542_v21, %v491_v12  ;;  %v372_v24 = vadd.f32 %v546_v22, %v491_v12  ;;  %v347_v25 = vpop.f32.mrb[3].mxu0  ;;  %v363_v26 = vpop.f32.mrb[3].mxu1 }
 0x14d   : > { %375 = vst [vmem:[%s203_s9] sm:$0xff] %v345_v19  ;;  %379 = vst [vmem:[%s203_s9 + $0x20] sm:$0xff] %v361_v20  ;;  %v348_v27 = vadd.f32 %v491_v12, %v347_v25  ;;  %v364_v28 = vadd.f32 %v491_v12, %v363_v26 }
 0x14e   : > { %378 = vst [vmem:[%s203_s9 + $0x18] sm:$0xff] %v356_v23  ;;  %382 = vst [vmem:[%s203_s9 + $0x38] sm:$0xff] %v372_v24 }
 0x14f   : > { %376 = vst [vmem:[%s203_s9 + $0x8] sm:$0xff] %v348_v27  ;;  %380 = vst [vmem:[%s203_s9 + $0x28] sm:$0xff] %v364_v28 }
 0x150   : > { %707 = shalt.err (!%p704_p7)
}
 0x151   : > { %s708_s22 = scalar_lea.hbm %s966_s5, 1024  ;;  %s712_s11 = scalar_lea.hbm %s1013_s3, 2048 }
 0x152   : > { %p709_p9 = scmp.ne.s32.totalorder %s966_s5, %s708_s22  ;;  %p713_p5 = scmp.lt.u32.totalorder %s966_s5, %s1013_s3 }
 0x153   : > { %p714_p11 = scmp.lt.u32.totalorder %s712_s11, %s708_s22  ;;  %p716_p4 = scmp.lt.u32.totalorder %s708_s22, %s966_s5 }
 0x154   : > { %p710_p1 = pnand %p709_p9, %p887_p12 }
 0x155   : > { %p715_p2 = por %p714_p11, %p713_p5 }
 0x156   : > { %p711_p0 = pneg %p710_p1 }
 0x157   : > { %p717_p6 = por %p716_p4, %p715_p2 }
 0x159   : > { %p718_p8 = pnand %p717_p6, %p711_p0 }
 0x15b   : > { %721 = shalt.err (!%p718_p8)
}
 0x15c   : > { %s771_s8 = smov 128   ;;  %s772_s9 = smov 8  }
 0x15d   : > { %569 = dma.vmem_to_hbm [thread:$0]  (%p887_p12), %s961_s4, 1024, %s966_s5, %s384_s27, %s771_s8, %s771_s8, %s772_s9  }
 0x15e PF: > { %s412_s25 = sand.u32 1, %s752_s12   ;;  %p1028_p10 = scmp.ne.s32.totalorder %s1018_s19, 0 }
 0x15f   : > { %p1029_p13 = scmp.ge.s32.totalorder %s764_s15, 2  ;;  %s413_s16 = scalar_lea.sflag [#allocation4], %s412_s25 }
 0x161   : > { %p580_p3 = pnand %p1029_p13, %p1028_p10 }
 0x163   : > { %747 = dma.done.wait (!%p580_p3), %s413_s16, 1024  }
 0x164   : > { %749 = vsyncadd (!%p580_p3), %s413_s16, 4294966272  ;;  %p17_p7 = scmp.ge.s32.totalorder %s849_s24, 4   ;;  %s1030_s12 = smov %s756_s13 }
 0x165   : > { %s1031_s13 = smov %s760_s14  ;;  %s1032_s14 = smov %s883_s17 }
 0x166   : > { %s1033_s15 = smov %s849_s24  ;;  %19 = sbr.rel (!%p17_p7) target bundleno = 6 (0x6), region = 81 }
 0x16d   :  { %418 = vsyncpa [#allocation3], 1 }
 0x16e   :  { %420 = vsyncpa [#allocation3 + $0x1], 1 }
 0x16f   :  { %421 = vsyncpa [#allocation6], 1 }
 0x170   :  { %422 = vsyncpa [#allocation4], 1 }
 0x171   :  { %424 = vsyncpa [#allocation4 + $0x1], 1 }

</bundles_post_ra>
